<compile_context>
chip_gen: v5e
topology: v5e:2x2
jax: 0.10.0
libtpu: 0.0.40
codegen_flags: <defaults>
</compile_context>

<pallas_src>
import functools
import math

import jax
import jax.numpy as jnp
from jax.experimental import pallas as pl
from jax.experimental.pallas import tpu as pltpu


def _cdiv(a, b):
    return (a + b - 1) // b


def _round_up(x, m):
    return ((x + m - 1) // m) * m


def _vmem_limit_bytes():
    """~75% of per-core VMEM (v7x: 48 of 64 MiB, v5e/v6e: 96 of 128 MiB)."""
    try:
        cap = int(pltpu.get_tpu_info().vmem_capacity_bytes)
    except Exception:  # off-TPU / attribute mismatch: conservative fallback
        cap = 64 * 1024 * 1024
    return int(cap * 3 // 4)


# ---------------- Kernel 1: support = X2 @ W (row-tiled) --------------------
def _support_kernel(x_ref, w_ref, out_ref):
    out_ref[...] = jnp.dot(
        x_ref[...], w_ref[...], preferred_element_type=jnp.float32
    ).astype(out_ref.dtype)


# ------------- Kernel 2: out = adj @ support (row- and K-tiled) -------------
def _aggregate_kernel(adj_ref, s_ref, out_ref, acc_ref, *, n_valid, tk, need_mask):
    k = pl.program_id(1)

    @pl.when(k == 0)
    def _():
        acc_ref[...] = jnp.zeros_like(acc_ref)

    a = adj_ref[...]        # raw adj tile (caller dtype); cast to bf16 below
    s = s_ref[...]          # bf16 support tile
    if need_mask:
        # The last K block extends past the real N: zero the out-of-bounds
        # adj columns / support rows (their VMEM contents are undefined).
        col = k * tk + jax.lax.broadcasted_iota(jnp.int32, a.shape, 1)
        a = jnp.where(col < n_valid, a, 0.0)
        row = k * tk + jax.lax.broadcasted_iota(jnp.int32, s.shape, 0)
        s = jnp.where(row < n_valid, s, 0.0)

    acc_ref[...] += jnp.dot(
        a.astype(jnp.bfloat16), s.astype(jnp.bfloat16),
        preferred_element_type=jnp.float32)

    @pl.when(k == pl.num_programs(1) - 1)
    def _():
        out_ref[...] = acc_ref[...].astype(out_ref.dtype)


def gcn_forward(x, adj, weight, *, tm=512, tk=1024, compute_dtype=jnp.bfloat16):
    """GCN forward: adj @ (x.reshape(N, -1) @ weight) -> (N, nhid*nhid) f32."""
    n = x.shape[0]
    x2 = x.reshape(n, -1)
    f_in = x2.shape[1]
    h = weight.shape[1]

    f_pad = _round_up(f_in, 128)      # lane-dense contraction dim of X2 @ W
    h_pad = _round_up(h, 128)         # lane-dense output dim (>= 128)

    # Row tile: multiple of 8 sublanes; force >= 2 row-grid steps when
    # possible so the "parallel" axis can shard across both v7x TensorCores.
    n8 = _round_up(n, 8)
    tm_eff = min(tm, n8)
    if _cdiv(n8, tm_eff) < 2 and n8 > 8:
        tm_eff = _round_up(_cdiv(n8, 2), 8)
    grid_rows = _cdiv(n, tm_eff)

    # K tile of the aggregation (contraction over the N graph nodes).
    if n < 128:
        tk_eff = n                          # one full-width K block (== full dim)
    else:
        tk_eff = min(tk, (n // 128) * 128)  # multiple of 128 lanes
    grid_k = _cdiv(n, tk_eff)
    need_mask = (n % tk_eff) != 0           # K tail needs in-kernel zeroing

    vmem_limit = _vmem_limit_bytes()

    # --- tiny operands: pad + cast in plain JAX (negligible vs adj bytes) ---
    x2_p = jnp.zeros((n, f_pad), compute_dtype).at[:, :f_in].set(
        x2.astype(compute_dtype))
    w_p = jnp.zeros((f_pad, h_pad), compute_dtype).at[:f_in, :h].set(
        weight.astype(compute_dtype))

    # ---- support = X2 @ W : computed exactly once, row tiles pipelined -----
    support = pl.pallas_call(
        _support_kernel,
        out_shape=jax.ShapeDtypeStruct((n, h_pad), compute_dtype),
        grid=(grid_rows,),
        in_specs=[
            pl.BlockSpec((tm_eff, f_pad), lambda i: (i, 0)),
            # Constant index map -> fetched once; at 128x128 bf16 the default
            # double buffer costs only 32 KiB, so pl.Buffered(1) is skipped.
            pl.BlockSpec((f_pad, h_pad), lambda i: (0, 0)),
        ],
        out_specs=pl.BlockSpec((tm_eff, h_pad), lambda i: (i, 0)),
        compiler_params=pltpu.CompilerParams(
            dimension_semantics=("parallel",),
            vmem_limit_bytes=vmem_limit,
        ),
        cost_estimate=pl.CostEstimate(
            flops=int(2 * n * f_pad * h_pad),
            transcendentals=0,
            bytes_accessed=int(2 * (n * f_pad + f_pad * h_pad + n * h_pad)),
        ),
    )(x2_p, w_p)

    # ---- out = adj @ support : adj streamed raw from HBM, K-tiled f32 acc --
    agg = functools.partial(
        _aggregate_kernel, n_valid=n, tk=tk_eff, need_mask=need_mask)
    out = pl.pallas_call(
        agg,
        out_shape=jax.ShapeDtypeStruct((n, h_pad), jnp.float32),
        grid=(grid_rows, grid_k),              # reduction axis last
        in_specs=[
            pl.BlockSpec((tm_eff, tk_eff), lambda i, k: (i, k)),
            pl.BlockSpec((tk_eff, h_pad), lambda i, k: (k, 0)),
        ],
        out_specs=pl.BlockSpec((tm_eff, h_pad), lambda i, k: (i, 0)),
        scratch_shapes=[pltpu.VMEM((tm_eff, h_pad), jnp.float32)],
        compiler_params=pltpu.CompilerParams(
            dimension_semantics=("parallel", "arbitrary"),
            vmem_limit_bytes=vmem_limit,
        ),
        cost_estimate=pl.CostEstimate(
            flops=int(2 * n * n * h_pad),
            transcendentals=0,
            bytes_accessed=int(adj.dtype.itemsize * n * n
                               + 2 * grid_rows * n * h_pad
                               + 4 * n * h_pad),
        ),
    )(adj, support)

    return out[:, :h]


if __name__ == "__main__":
    key = jax.random.PRNGKey(0)

    def make_inputs(k, n_nodes, nfeat, nhid):
        f_in, f_out = nfeat * nfeat, nhid * nhid
        kx, kadj, kw = jax.random.split(k, 3)
        x = jax.random.normal(kx, (n_nodes, nfeat, nfeat), dtype=jnp.float32)
        adj = jax.random.uniform(kadj, (n_nodes, n_nodes), dtype=jnp.float32)
        # GraphConvolution.reset_parameters: uniform(-stdv, stdv), stdv=1/sqrt(out)
        stdv = 1.0 / math.sqrt(f_out)
        w = jax.random.uniform(kw, (f_in, f_out), dtype=jnp.float32,
                               minval=-stdv, maxval=stdv)
        return x, adj, w

    k1, k2 = jax.random.split(key)

    # --- case 1: toy module shapes (N=8, nfeat=4, nhid=4); single tile ---
    x, adj, w = make_inputs(k1, 8, 4, 4)
    out = jax.block_until_ready(gcn_forward(x, adj, w))
    ref = adj @ (x.reshape(x.shape[0], -1) @ w)
    assert out.shape == ref.shape
    assert jnp.allclose(out, ref, atol=5e-2, rtol=5e-2), "case1 mismatch"

    # --- case 2: partial row tiles + K-tiled reduction + tail masking ---
    x, adj, w = make_inputs(k2, 300, 4, 4)
    out = jax.block_until_ready(gcn_forward(x, adj, w, tm=128, tk=128))
    ref = adj @ (x.reshape(x.shape[0], -1) @ w)
    assert out.shape == ref.shape
    assert jnp.allclose(out, ref, atol=5e-2, rtol=5e-2), "case2 mismatch"

    print("KERNEL_OK")
</pallas_src>

<mosaic_0001>
module attributes {stable_mosaic.version = 11 : i64} {
  func.func @_support_kernel(%arg0: i32, %arg1: memref<8x128xbf16, #tpu.memory_space<vmem>>, %arg2: memref<128x128xbf16, #tpu.memory_space<vmem>>, %arg3: memref<8x128xbf16, #tpu.memory_space<vmem>>) attributes {dimension_semantics = [#tpu.dimension_semantics<parallel>], iteration_bounds = array<i64: 1>, scalar_prefetch = 0 : i64, scratch_operands = 0 : i64, tpu.core_type = #tpu.core_type<tc>, window_params = [{transform_indices = @transform_0, window_bounds = array<i64: 8, 128>}, {pipeline_mode = #tpu.pipeline_mode<synchronous>, transform_indices = @transform_1, window_bounds = array<i64: 128, 128>}, {transform_indices = @transform_2, window_bounds = array<i64: 8, 128>}]} {
    %c0 = arith.constant 0 : index
    %c0_0 = arith.constant 0 : index
    %0 = vector.load %arg1[%c0, %c0_0] : memref<8x128xbf16, #tpu.memory_space<vmem>>, vector<8x128xbf16>
    %c0_1 = arith.constant 0 : index
    %c0_2 = arith.constant 0 : index
    %1 = vector.load %arg2[%c0_1, %c0_2] : memref<128x128xbf16, #tpu.memory_space<vmem>>, vector<128x128xbf16>
    %cst = arith.constant dense<0.000000e+00> : vector<8x128xf32>
    %2 = tpu.matmul %0, %1, %cst {dimension_numbers = #tpu.dot_dimension_numbers<[1], [0], [0], [1], [0, 0, 1, 1], [], []>} : vector<8x128xbf16>, vector<128x128xbf16>, vector<8x128xf32> -> vector<8x128xf32>
    %3 = arith.truncf %2 : vector<8x128xf32> to vector<8x128xbf16>
    %c0_3 = arith.constant 0 : index
    %c0_4 = arith.constant 0 : index
    %4 = vector.load %arg3[%c0_3, %c0_4] : memref<8x128xbf16, #tpu.memory_space<vmem>>, vector<8x128xbf16>
    tpu.vector_store %arg3[%c0_3, %c0_4], %3 {strides = array<i32>} : memref<8x128xbf16, #tpu.memory_space<vmem>>, vector<8x128xbf16>,
    return
  }
  func.func @transform_0(%arg0: i32) -> (i32, i32) {
    %c0_i32 = arith.constant 0 : i32
    %c0_i32_0 = arith.constant 0 : i32
    return %arg0, %c0_i32 : i32, i32
  }
  func.func @transform_1(%arg0: i32) -> (i32, i32) {
    %c0_i32 = arith.constant 0 : i32
    %c0_i32_0 = arith.constant 0 : i32
    %c0_i32_1 = arith.constant 0 : i32
    return %c0_i32, %c0_i32_0 : i32, i32
  }
  func.func @transform_2(%arg0: i32) -> (i32, i32) {
    %c0_i32 = arith.constant 0 : i32
    %c0_i32_0 = arith.constant 0 : i32
    return %arg0, %c0_i32 : i32, i32
  }
}

</mosaic_0001>

<bundles_post_ra>
// kernel: tpu_custom_call.1
= control target key start
LH: loop header
LB: loop body
LE: loop exit
PB: predicated region body
PF: predicated region fallthrough
CT: control target
= control target key end

     0   :  { %7 = vsyncpa [#allocation3], 0  ;;  %s292_s0 = inlined_call_operand.hbm [shape: bf16[8,128], index: 0, kind: input, shape index: {}]   ;;  %s293_s1 = inlined_call_operand.hbm [shape: bf16[128,128], index: 1, kind: input, shape index: {}]   ;;  %s294_s2 = inlined_call_operand.hbm [shape: bf16[8,128], index: 2, kind: output, shape index: {}]  }
   0x1   :  { %8 = vsyncpa [#allocation6], 0 }
   0x2   :  { %9 = vsyncpa [#allocation4], 0  ;;  %s15_s11 = sshll.u32 %s292_s0, 4  ;;  %s263_s12 = smov [#allocation2]   ;;  %s16_s11 = int_to_ptr.hbm [resolvable:$true] %s15_s11 }
   0x3   :  { %s17_s13 = sshll.u32 %s263_s12, 4  ;;  %s25_s16 = sshll.u32 %s293_s1, 4  ;;  %s18_s13 = int_to_ptr.vmem [resolvable:$true] %s17_s13  ;;  %s26_s16 = int_to_ptr.hbm [resolvable:$true] %s25_s16 }
   0x4   :  { %20 = dma.hbm_to_vmem [thread:$0]  %s16_s11, 64, %s18_s13, [#allocation3]  }
   0x5   :  { %s264_s17 = smov [#allocation5]   ;;  %s265_s19 = smov 64  }
   0x6   :  { %s27_s18 = sshll.u32 %s264_s17, 4  ;;  %s266_s20 = smov 4   ;;  %s28_s18 = int_to_ptr.vmem [resolvable:$true] %s27_s18 }
   0x7   :  { %33 = dma.hbm_to_vmem [thread:$0]  %s26_s16, 1024, %s28_s18, [#allocation6], %s265_s19, %s265_s19, %s266_s20  }
   0x8   :  { %257 = dma.done.wait [#allocation3], 64  }
   0x9   :  { %258 = vsyncadd [#allocation3], 4294967232 }
   0xa   :  { %259 = dma.done.wait [#allocation6], 1024  }
   0xb   :  { %260 = vsyncadd [#allocation6], 4294966272  ;;  %v179_v0 = vld [vmem:[#allocation5 + $0x38] sm:$0xff]  ;;  %v178_v1 = vld [vmem:[#allocation5 + $0x30] sm:$0xff]  ;;  %s267_s0 = smov [#allocation7]   ;;  %s129_s23 = sshll.u32 %s294_s2, 4  ;;  %s130_s23 = int_to_ptr.hbm [resolvable:$true] %s129_s23 }
   0xc   :  { %107 = vmatpush.bf16.msra.mxu0 %v179_v0  ;;  %v177_v2 = vld [vmem:[#allocation5 + $0x28] sm:$0xff]  ;;  %v176_v3 = vld [vmem:[#allocation5 + $0x20] sm:$0xff]  ;;  %v175_v4 = vld [vmem:[#allocation5 + $0x18] sm:$0xff]  ;;  %s127_s1 = sshll.u32 %s267_s0, 4  ;;  %s128_s1 = int_to_ptr.vmem [resolvable:$true] %s127_s1 }
   0xd   :  { %v174_v5 = vld [vmem:[#allocation5 + $0x10] sm:$0xff]  ;;  %v173_v6 = vld [vmem:[#allocation5 + $0x8] sm:$0xff]  ;;  %v172_v7 = vld [vmem:[#allocation5] sm:$0xff] }
   0xe   :  { %v42_v8 = vld [vmem:[#allocation2] sm:$0xf] }
  0x10   :  { %108 = vmatpush.bf16.msra.mxu0 %v178_v1 }
  0x14   :  { %109 = vmatpush.bf16.msra.mxu0 %v177_v2 }
  0x18   :  { %110 = vmatpush.bf16.msra.mxu0 %v176_v3 }
  0x1c   :  { %111 = vmatpush.bf16.msra.mxu0 %v175_v4 }
  0x20   :  { %112 = vmatpush.bf16.msra.mxu0 %v174_v5 }
  0x24   :  { %113 = vmatpush.bf16.msra.mxu0 %v173_v6 }
  0x28   :  { %114 = vmatpush.bf16.msra.mxu0 %v172_v7 }
  0x2b   :  { %115 = vmatmul.bf16.vlgmr.msra.gmra.mxu0 %v42_v8 }
  0xa8   :  { %v116_v9 = vpop.f32.mrf.mxu0 }
  0xa9   :  { %v120_v10 = vpack.c.bf16 %v116_v9, %v116_v9 }
  0xab   :  { %121 = vst [vmem:[#allocation7] sm:$0xf] %v120_v10 }
  0xac   :  { %132 = dma.vmem_to_hbm [thread:$0]  %s128_s1, 64, %s130_s23, [#allocation4]  }
  0xb0   :  { %v118_v11 = vpop.f32.mrf.mxu0 }
  0xb1   :  { %261 = dma.done.wait [#allocation4], 64  }
  0xb2   :  { %262 = vsyncadd [#allocation4], 4294967232 }
  0xb3   :  { %137 = vsyncpa [#allocation3], 1 }
  0xb4   :  { %138 = vsyncpa [#allocation6], 1 }
  0xb5   :  { %139 = vsyncpa [#allocation4], 1 }

</bundles_post_ra>
